<compile_context>
chip_gen: v5e
topology: v5e:2x2
jax: 0.10.0
libtpu: 0.0.40
codegen_flags: <defaults>
</compile_context>

<pallas_src>
import numpy as np
import jax
import jax.numpy as jnp
from jax.experimental import pallas as pl
from jax.experimental.pallas import tpu as pltpu

_BN_EPS = 1e-5
_RESNET50_BLOCKS = (3, 4, 6, 3)
_EXPANSION = 4


# --------------------------- tile-size helpers --------------------------------

def _mxu_lane_tile():
    # v5e MXU is 128-wide; v6e/v7x are 256-wide.  256-wide tiles on v5e only
    # add VMEM pressure without MXU benefit, so right-size per generation.
    try:
        kind = jax.devices()[0].device_kind.lower()
    except Exception:
        kind = ""
    if "v5 lite" in kind or "v5e" in kind or "v5litepod" in kind:
        return 128
    return 256


_TN_PREF = _mxu_lane_tile()
_TM_CANDIDATES = (512, 256, 128)   # all multiples of 16 (bf16 sublane packing)


def _pick_tile(dim, candidates):
    """Largest candidate that divides dim exactly, else the full dim."""
    for c in candidates:
        if dim % c == 0:
            return c
    return dim


# --------------------------- Pallas kernels -----------------------------------

def _mm_bias_kernel(x_ref, w_ref, b_ref, o_ref):
    acc = jnp.dot(x_ref[...], w_ref[...], preferred_element_type=jnp.float32)
    o_ref[...] = (acc + b_ref[...]).astype(o_ref.dtype)


def _mm_bias_relu_kernel(x_ref, w_ref, b_ref, o_ref):
    acc = jnp.dot(x_ref[...], w_ref[...], preferred_element_type=jnp.float32)
    o_ref[...] = jnp.maximum(acc + b_ref[...], 0.0).astype(o_ref.dtype)


def _mm_bias_res_relu_kernel(x_ref, w_ref, b_ref, r_ref, o_ref):
    # conv3 of each bottleneck: (x @ w) + bias + identity, then ReLU — the
    # residual add/ReLU is fused here instead of a separate HBM round-trip.
    acc = jnp.dot(x_ref[...], w_ref[...], preferred_element_type=jnp.float32)
    acc = acc + b_ref[...] + r_ref[...].astype(jnp.float32)
    o_ref[...] = jnp.maximum(acc, 0.0).astype(o_ref.dtype)


def fused_matmul(x, w, bias, *, relu, residual=None, out_dtype=jnp.bfloat16):
    """o = (x @ w) + bias (+ residual) (+ ReLU), bf16 in / f32 accumulate.

    BN scale is pre-folded into `w`, so the epilogue is bias-only.  M and N are
    tiled (both "parallel"); K is kept whole (max K = 4608 -> ~2.3 MB bf16 per
    weight tile, well inside the 32 MiB scoped-VMEM default on every gen)."""
    M, K = x.shape
    K2, N = w.shape
    assert K == K2
    x = x.astype(jnp.bfloat16)
    w = w.astype(jnp.bfloat16)
    bias = bias.reshape(1, N).astype(jnp.float32)

    TM = _pick_tile(M, _TM_CANDIDATES)
    TN = _pick_tile(N, (_TN_PREF, 128))
    grid = (M // TM, N // TN)

    in_specs = [
        pl.BlockSpec((TM, K), lambda i, j: (i, 0)),
        pl.BlockSpec((K, TN), lambda i, j: (0, j)),
        pl.BlockSpec((1, TN), lambda i, j: (0, j)),
    ]
    args = [x, w, bias]
    if residual is not None:
        assert relu
        kernel = _mm_bias_res_relu_kernel
        in_specs.append(pl.BlockSpec((TM, TN), lambda i, j: (i, j)))
        args.append(residual.astype(jnp.bfloat16))
    else:
        kernel = _mm_bias_relu_kernel if relu else _mm_bias_kernel

    return pl.pallas_call(
        kernel,
        out_shape=jax.ShapeDtypeStruct((M, N), out_dtype),
        grid=grid,
        in_specs=in_specs,
        out_specs=pl.BlockSpec((TM, TN), lambda i, j: (i, j)),
        compiler_params=pltpu.CompilerParams(
            dimension_semantics=("parallel", "parallel")),
    )(*args)


def _max_over_window_kernel(p_ref, o_ref):
    o_ref[...] = jnp.max(p_ref[...], axis=1)


def max_over_window(patches):  # [M, k*k, C] -> [M, C], tiled over M
    M, KK, C = patches.shape
    TM = _pick_tile(M, (1024, 512, 256, 128))
    return pl.pallas_call(
        _max_over_window_kernel,
        out_shape=jax.ShapeDtypeStruct((M, C), patches.dtype),
        grid=(M // TM,),
        in_specs=[pl.BlockSpec((TM, KK, C), lambda i: (i, 0, 0))],
        out_specs=pl.BlockSpec((TM, C), lambda i: (i, 0)),
        compiler_params=pltpu.CompilerParams(dimension_semantics=("parallel",)),
    )(patches)


def _head_kernel(x_ref, w1_ref, b1_ref, w2_ref, b2_ref, o_ref):
    # AdaptiveAvgPool2d(1) + flatten + Dropout(eval=id) + Linear(2048,512)
    # + ReLU + Dropout(eval=id) + Linear(512,num_classes), fused: at small
    # batch these ops are pure launch overhead as separate kernels.
    feats = jnp.mean(x_ref[...].astype(jnp.float32), axis=1)          # (N, C)
    h = jnp.dot(feats.astype(jnp.bfloat16), w1_ref[...],
                preferred_element_type=jnp.float32)
    h = jnp.maximum(h + b1_ref[...], 0.0)
    logits = jnp.dot(h.astype(jnp.bfloat16), w2_ref[...],
                     preferred_element_type=jnp.float32)
    o_ref[...] = logits + b2_ref[...]


def classifier_head(x, fc1, fc2):
    N, H, W, C = x.shape
    xm = x.reshape(N, H * W, C).astype(jnp.bfloat16)
    hidden = fc1["w"].shape[1]
    num_classes = fc2["w"].shape[1]
    # TODO(synk): num_classes < 128 gives a masked (non-lane-dense) store; at
    #             (batch, num_classes) size this is negligible.
    return pl.pallas_call(
        _head_kernel,
        out_shape=jax.ShapeDtypeStruct((N, num_classes), jnp.float32),
        grid=(1,),
        in_specs=[
            pl.BlockSpec((N, H * W, C), lambda i: (0, 0, 0)),
            pl.BlockSpec((C, hidden), lambda i: (0, 0)),
            pl.BlockSpec((1, hidden), lambda i: (0, 0)),
            pl.BlockSpec((hidden, num_classes), lambda i: (0, 0)),
            pl.BlockSpec((1, num_classes), lambda i: (0, 0)),
        ],
        out_specs=pl.BlockSpec((N, num_classes), lambda i: (0, 0)),
    )(xm,
      fc1["w"].astype(jnp.bfloat16),
      fc1["b"].reshape(1, hidden).astype(jnp.float32),
      fc2["w"].astype(jnp.bfloat16),
      fc2["b"].reshape(1, num_classes).astype(jnp.float32))


# --------------------------- conv / pool glue ----------------------------------

def _extract_patches(x, kh, kw, stride, pad, pad_value=0.0):
    # x: [N, H, W, C] -> ([N, Ho, Wo, kh*kw, C], Ho, Wo); bf16 throughout.
    N, H, W, C = x.shape
    xp = x if pad == 0 else jnp.pad(
        x, ((0, 0), (pad, pad), (pad, pad), (0, 0)), constant_values=pad_value)
    Ho = (H + 2 * pad - kh) // stride + 1
    Wo = (W + 2 * pad - kw) // stride + 1
    cols = []
    for i in range(kh):
        for j in range(kw):
            cols.append(xp[:, i:i + (Ho - 1) * stride + 1:stride,
                           j:j + (Wo - 1) * stride + 1:stride, :])
    patches = jnp.stack(cols, axis=3)
    return patches, Ho, Wo


def conv_bn(x, p, kh, kw, stride, pad, relu, residual=None):
    N, H, W, C = x.shape
    if kh == 1 and kw == 1 and pad == 0:
        # 1x1 conv: no im2col needed at all (strided slice only if stride > 1).
        xs = x[:, ::stride, ::stride, :] if stride != 1 else x
        Ho, Wo = xs.shape[1], xs.shape[2]
        cols = xs.reshape(N * Ho * Wo, C)
    else:
        # TODO(synk): replace im2col materialization with an in-kernel tap
        #             reduction (grid axis over kh*kw taps + VMEM accumulator)
        #             to cut HBM traffic ~kh*kw-fold on 3x3/7x7 convs.
        patches, Ho, Wo = _extract_patches(x, kh, kw, stride, pad)
        cols = patches.reshape(N * Ho * Wo, kh * kw * C)
    res = None
    if residual is not None:
        res = residual.reshape(N * Ho * Wo, residual.shape[-1])
    y = fused_matmul(cols, p["w"], p["bias"], relu=relu, residual=res)
    return y.reshape(N, Ho, Wo, -1)


def max_pool(x, k, stride, pad):
    N, H, W, C = x.shape
    patches, Ho, Wo = _extract_patches(x, k, k, stride, pad, pad_value=-1e30)
    y = max_over_window(patches.reshape(N * Ho * Wo, k * k, C))
    return y.reshape(N, Ho, Wo, C)


# --------------------------- parameter init ------------------------------------

def _init_conv_bn(key, kh, kw, cin, cout):
    k1, k2, k3 = jax.random.split(key, 3)
    fan_in = kh * kw * cin
    # Conv weight pre-flattened for im2col: [kh*kw*cin, cout]
    w = jax.random.normal(k1, (fan_in, cout), jnp.float32) * np.sqrt(2.0 / fan_in)
    gamma = 1.0 + 0.1 * jax.random.normal(k2, (cout,), jnp.float32)
    beta = 0.1 * jax.random.normal(k3, (cout,), jnp.float32)
    scale = gamma / np.sqrt(1.0 + _BN_EPS)   # eval BN: running mean=0, var=1
    # Fold BN scale into the weights (kernel epilogue is bias-only), store bf16.
    w_folded = (w * scale[None, :]).astype(jnp.bfloat16)
    return {"w": w_folded, "bias": beta}


def _init_linear(key, cin, cout):
    k1, k2 = jax.random.split(key)
    w = (jax.random.normal(k1, (cin, cout), jnp.float32)
         * np.sqrt(1.0 / cin)).astype(jnp.bfloat16)
    b = 0.01 * jax.random.normal(k2, (cout,), jnp.float32)
    return {"w": w, "b": b}


def init_resnet50_multilabel_params(key, num_classes):
    keys = iter(jax.random.split(key, 128))
    params = {"conv1": _init_conv_bn(next(keys), 7, 7, 3, 64)}
    inplanes = 64
    layers = []
    for planes, nblocks, stride in zip((64, 128, 256, 512),
                                       _RESNET50_BLOCKS, (1, 2, 2, 2)):
        blocks = []
        for b in range(nblocks):
            s = stride if b == 0 else 1
            blk = {
                "conv1": _init_conv_bn(next(keys), 1, 1, inplanes, planes),
                "conv2": _init_conv_bn(next(keys), 3, 3, planes, planes),
                "conv3": _init_conv_bn(next(keys), 1, 1, planes,
                                       planes * _EXPANSION),
                "stride": s,
            }
            if s != 1 or inplanes != planes * _EXPANSION:
                blk["downsample"] = _init_conv_bn(next(keys), 1, 1, inplanes,
                                                  planes * _EXPANSION)
            blocks.append(blk)
            inplanes = planes * _EXPANSION
        layers.append(blocks)
    params["layers"] = layers
    num_features = 512 * _EXPANSION          # 2048 for resnet50
    params["fc1"] = _init_linear(next(keys), num_features, 512)
    params["fc2"] = _init_linear(next(keys), 512, num_classes)
    return params


# --------------------------- forward --------------------------------------------

def _bottleneck(x, blk):
    if "downsample" in blk:
        identity = conv_bn(x, blk["downsample"], 1, 1, blk["stride"], 0,
                           relu=False)
    else:
        identity = x
    out = conv_bn(x, blk["conv1"], 1, 1, 1, 0, relu=True)
    out = conv_bn(out, blk["conv2"], 3, 3, blk["stride"], 1, relu=True)
    # Residual add + ReLU fused into conv3's matmul epilogue.
    out = conv_bn(out, blk["conv3"], 1, 1, 1, 0, relu=True, residual=identity)
    return out


def resnet_multilabel_forward(params, x_nchw):
    # Input is NCHW (PyTorch); compute internally in NHWC bf16.
    x = jnp.transpose(x_nchw, (0, 2, 3, 1)).astype(jnp.bfloat16)
    # backbone = Sequential(children[:-1]): conv1/bn/relu, maxpool, layers1-4, avgpool
    x = conv_bn(x, params["conv1"], 7, 7, 2, 3, relu=True)
    x = max_pool(x, 3, 2, 1)
    for blocks in params["layers"]:
        for blk in blocks:
            x = _bottleneck(x, blk)
    # avgpool + flatten + classifier (Dropout=id in eval), fused in one kernel.
    return classifier_head(x, params["fc1"], params["fc2"])


# --------------------------- demo ------------------------------------------------

if __name__ == "__main__":
    num_classes = 10
    key = jax.random.PRNGKey(0)
    pkey, xkey = jax.random.split(key)
    params = init_resnet50_multilabel_params(pkey, num_classes)
    # Small PyTorch-convention NCHW image batch: [N=2, C=3, H=16, W=16]
    x = jax.random.normal(xkey, (2, 3, 16, 16), jnp.float32)
    out = resnet_multilabel_forward(params, x)
    out = jax.block_until_ready(out)
    assert out.shape == (2, num_classes), out.shape
    assert np.all(np.isfinite(np.asarray(out, dtype=np.float32)))
    print("KERNEL_OK")
</pallas_src>

<mosaic_0001>
module attributes {stable_mosaic.version = 11 : i64} {
  func.func @_mm_bias_relu_kernel(%arg0: i32, %arg1: i32, %arg2: memref<128x147xbf16, #tpu.memory_space<vmem>>, %arg3: memref<147x64xbf16, #tpu.memory_space<vmem>>, %arg4: memref<1x64xf32, #tpu.memory_space<vmem>>, %arg5: memref<128x64xbf16, #tpu.memory_space<vmem>>) attributes {dimension_semantics = [#tpu.dimension_semantics<parallel>, #tpu.dimension_semantics<parallel>], iteration_bounds = array<i64: 1, 1>, scalar_prefetch = 0 : i64, scratch_operands = 0 : i64, tpu.core_type = #tpu.core_type<tc>, window_params = [{transform_indices = @transform_0, window_bounds = array<i64: 128, 147>}, {transform_indices = @transform_1, window_bounds = array<i64: 147, 64>}, {transform_indices = @transform_2, window_bounds = array<i64: 1, 64>}, {transform_indices = @transform_3, window_bounds = array<i64: 128, 64>}]} {
    %c0 = arith.constant 0 : index
    %c0_0 = arith.constant 0 : index
    %0 = vector.load %arg2[%c0, %c0_0] : memref<128x147xbf16, #tpu.memory_space<vmem>>, vector<128x147xbf16>
    %c0_1 = arith.constant 0 : index
    %c0_2 = arith.constant 0 : index
    %1 = vector.load %arg3[%c0_1, %c0_2] : memref<147x64xbf16, #tpu.memory_space<vmem>>, vector<147x64xbf16>
    %cst = arith.constant dense<0.000000e+00> : vector<128x64xf32>
    %2 = tpu.matmul %0, %1, %cst {dimension_numbers = #tpu.dot_dimension_numbers<[1], [0], [0], [1], [0, 0, 1, 1], [], []>} : vector<128x147xbf16>, vector<147x64xbf16>, vector<128x64xf32> -> vector<128x64xf32>
    %c0_3 = arith.constant 0 : index
    %c0_4 = arith.constant 0 : index
    %3 = vector.load %arg4[%c0_3, %c0_4] : memref<1x64xf32, #tpu.memory_space<vmem>>, vector<1x64xf32>
    %4 = vector.broadcast %3 : vector<1x64xf32> to vector<128x64xf32>
    %5 = arith.addf %2, %4 : vector<128x64xf32>
    %cst_5 = arith.constant 0.000000e+00 : f32
    %6 = vector.broadcast %cst_5 : f32 to vector<128x64xf32>
    %7 = arith.maximumf %5, %6 : vector<128x64xf32>
    %8 = arith.truncf %7 : vector<128x64xf32> to vector<128x64xbf16>
    %c0_6 = arith.constant 0 : index
    %c0_7 = arith.constant 0 : index
    %9 = vector.load %arg5[%c0_6, %c0_7] : memref<128x64xbf16, #tpu.memory_space<vmem>>, vector<128x64xbf16>
    tpu.vector_store %arg5[%c0_6, %c0_7], %8 {strides = array<i32>} : memref<128x64xbf16, #tpu.memory_space<vmem>>, vector<128x64xbf16>,
    return
  }
  func.func @transform_0(%arg0: i32, %arg1: i32) -> (i32, i32) {
    %c0_i32 = arith.constant 0 : i32
    %c0_i32_0 = arith.constant 0 : i32
    return %arg0, %c0_i32 : i32, i32
  }
  func.func @transform_1(%arg0: i32, %arg1: i32) -> (i32, i32) {
    %c0_i32 = arith.constant 0 : i32
    %c0_i32_0 = arith.constant 0 : i32
    return %c0_i32, %arg1 : i32, i32
  }
  func.func @transform_2(%arg0: i32, %arg1: i32) -> (i32, i32) {
    %c0_i32 = arith.constant 0 : i32
    %c0_i32_0 = arith.constant 0 : i32
    return %c0_i32, %arg1 : i32, i32
  }
  func.func @transform_3(%arg0: i32, %arg1: i32) -> (i32, i32) {
    %c0_i32 = arith.constant 0 : i32
    return %arg0, %arg1 : i32, i32
  }
}

</mosaic_0001>

<bundles_post_ra>
// kernel: tpu_custom_call.1
= control target key start
LH: loop header
LB: loop body
LE: loop exit
PB: predicated region body
PF: predicated region fallthrough
CT: control target
= control target key end

     0   :  { %vm208_vm0 = vcmask 1040384   ;;  %vm209_vm1 = vcmask 1041408   ;;  %v511_v2 = vmov 65535   ;;  %vm183_vm2 = vcmask 154624   ;;  %s751_s1 = inlined_call_operand.vmem [shape: bf16[147,64], index: 1, kind: input, shape index: {}]   ;;  %s752_s0 = inlined_call_operand.vmem [shape: bf16[128,147], index: 0, kind: input, shape index: {}]   ;;  %s753_s2 = inlined_call_operand.vmem [shape: f32[1,64], index: 2, kind: input, shape index: {}]   ;;  %s754_s3 = inlined_call_operand.vmem [shape: bf16[128,64], index: 3, kind: output, shape index: {}]  }
   0x1   :  { %v497_v0 = vld [vmem:[%s751_s1 + $0x38] sm:$0xff]  ;;  %v49_v1 = vld [vmem:[%s751_s1 + $0x48] sm:$0x3]  ;;  %v210_v3 = vsel %vm208_vm0, 4294967295, %v511_v2  ;;  %v496_v5 = vld [vmem:[%s751_s1 + $0x30] sm:$0xff]  ;;  %vm345_vm3 = vcmask 519168  }
   0x2   :  { %v163_v4 = vunpack.c.l.b16 %v49_v1  ;;  %215 = vmatpush.bf16.msra.mxu0 %v497_v0  ;;  %499 = vmatpush.bf16.msra.mxu2 %v497_v0  ;;  %v211_v6 = vsel %vm209_vm1, %v210_v3, 0  ;;  %v495_v9 = vld [vmem:[%s751_s1 + $0x28] sm:$0xff]  ;;  %v498_v10 = vld [vmem:[%s751_s1 + $0x40] sm:$0xff]  ;;  %v484_v13 = vld [vmem:[%s752_s0 + $0x54] sm:$0xf] }
   0x3   :  { %v474_v11 = vld [vmem:[%s752_s0 + $0x4] sm:$0xf]  ;;  %v370_v12 = vld [vmem:[%s752_s0 + $0x8] sm:$0xf0]  ;;  %v410_v14 = vld [vmem:[%s752_s0 + $0x58] sm:$0xf0] }
   0x4   :  { %v173_v7 = vpack.c.b16 %v163_v4, %v163_v4  ;;  %v373_v15 = vor.u32 %v474_v11, %v370_v12  ;;  %v494_v16 = vld [vmem:[%s751_s1 + $0x20] sm:$0xff]  ;;  %v413_v17 = vor.u32 %v484_v13, %v410_v14  ;;  %v493_v18 = vld [vmem:[%s751_s1 + $0x18] sm:$0xff]  ;;  %v492_v19 = vld [vmem:[%s751_s1 + $0x10] sm:$0xff] }
   0x5   :  { %v491_v20 = vld [vmem:[%s751_s1 + $0x8] sm:$0xff]  ;;  %v476_v21 = vld [vmem:[%s752_s0 + $0x14] sm:$0xf]  ;;  %v378_v22 = vld [vmem:[%s752_s0 + $0x18] sm:$0xf0] }
   0x6   :  { %v213_v8 = vand.u32 %v211_v6, %v173_v7  ;;  %216 = vmatpush.bf16.msra.mxu0 %v496_v5  ;;  %500 = vmatpush.bf16.msra.mxu2 %v496_v5  ;;  %v486_v23 = vld [vmem:[%s752_s0 + $0x64] sm:$0xf]  ;;  %v418_v24 = vld [vmem:[%s752_s0 + $0x68] sm:$0xf0]  ;;  %v381_v25 = vor.u32 %v476_v21, %v378_v22  ;;  %v368_v27 = vld [vmem:[%s752_s0] sm:$0xf] }
   0x7   :  { %v490_v26 = vld [vmem:[%s751_s1] sm:$0xff]  ;;  %v475_v28 = vld [vmem:[%s752_s0 + $0x4] sm:$0xf0]  ;;  %v421_v31 = vor.u32 %v486_v23, %v418_v24  ;;  %v386_v35 = vld [vmem:[%s752_s0 + $0x28] sm:$0xf0] }
   0x8   :  { %270 = vmatpush.bf16.msra.mxu1 %v213_v8  ;;  %507 = vmatpush.bf16.msra.mxu3 %v213_v8  ;;  %v400_v29 = vld [vmem:[%s752_s0 + $0x40] sm:$0xf]  ;;  %v483_v30 = vld [vmem:[%s752_s0 + $0x44] sm:$0xf0]  ;;  %v369_v32 = vor.u32 %v475_v28, %v368_v27  ;;  %v478_v34 = vld [vmem:[%s752_s0 + $0x24] sm:$0xf] }
   0x9   :  { %v401_v33 = vor.u32 %v483_v30, %v400_v29  ;;  %v488_v36 = vld [vmem:[%s752_s0 + $0x74] sm:$0xf]  ;;  %v426_v37 = vld [vmem:[%s752_s0 + $0x78] sm:$0xf0]  ;;  %v389_v38 = vor.u32 %v478_v34, %v386_v35  ;;  %v376_v39 = vld [vmem:[%s752_s0 + $0x10] sm:$0xf] }
   0xa   :  { %217 = vmatpush.bf16.msra.mxu0 %v495_v9  ;;  %501 = vmatpush.bf16.msra.mxu2 %v495_v9  ;;  %v477_v40 = vld [vmem:[%s752_s0 + $0x14] sm:$0xf0]  ;;  %v408_v41 = vld [vmem:[%s752_s0 + $0x50] sm:$0xf]  ;;  %v429_v43 = vor.u32 %v488_v36, %v426_v37  ;;  %v480_v46 = vld [vmem:[%s752_s0 + $0x34] sm:$0xf] }
   0xb   :  { %v485_v42 = vld [vmem:[%s752_s0 + $0x54] sm:$0xf0]  ;;  %v377_v44 = vor.u32 %v477_v40, %v376_v39  ;;  %v394_v47 = vld [vmem:[%s752_s0 + $0x38] sm:$0xf0]  ;;  %v384_v49 = vld [vmem:[%s752_s0 + $0x20] sm:$0xf] }
   0xc   :  { %271 = vmatpush.bf16.msra.mxu1 %v498_v10  ;;  %508 = vmatpush.bf16.msra.mxu3 %v498_v10  ;;  %v409_v45 = vor.u32 %v485_v42, %v408_v41  ;;  %v397_v48 = vor.u32 %v480_v46, %v394_v47  ;;  %v479_v50 = vld [vmem:[%s752_s0 + $0x24] sm:$0xf0]  ;;  %v416_v51 = vld [vmem:[%s752_s0 + $0x60] sm:$0xf]  ;;  %v482_v55 = vld [vmem:[%s752_s0 + $0x44] sm:$0xf] }
   0xd   :  { %v487_v52 = vld [vmem:[%s752_s0 + $0x64] sm:$0xf0]  ;;  %v385_v53 = vor.u32 %v479_v50, %v384_v49  ;;  %v402_v56 = vld [vmem:[%s752_s0 + $0x48] sm:$0xf0]  ;;  %v392_v58 = vld [vmem:[%s752_s0 + $0x30] sm:$0xf] }
   0xe   :  { %218 = vmatpush.bf16.msra.mxu0 %v494_v16  ;;  %502 = vmatpush.bf16.msra.mxu2 %v494_v16  ;;  %v417_v54 = vor.u32 %v487_v52, %v416_v51  ;;  %v405_v57 = vor.u32 %v482_v55, %v402_v56  ;;  %v481_v59 = vld [vmem:[%s752_s0 + $0x34] sm:$0xf0]  ;;  %v424_v60 = vld [vmem:[%s752_s0 + $0x70] sm:$0xf]  ;;  %v669_v3 = vld [vmem:[%s753_s2] ss:$0 sm:$0xff] }
   0xf   :  { %466 = vmatmul.msk.bf16.vlgmr.msra.gmra.mxu1 %vm183_vm2, %v373_v15  ;;  %471 = vmatmul.msk.bf16.vlgmr.msra.gmra.mxu3 %vm183_vm2, %v413_v17  ;;  %v489_v61 = vld [vmem:[%s752_s0 + $0x74] sm:$0xf0]  ;;  %v393_v62 = vor.u32 %v481_v59, %v392_v58 }
  0x10   :  { %v425_v63 = vor.u32 %v489_v61, %v424_v60 }
  0x12   :  { %219 = vmatpush.bf16.msra.mxu0 %v493_v18  ;;  %503 = vmatpush.bf16.msra.mxu2 %v493_v18 }
  0x16   :  { %220 = vmatpush.bf16.msra.mxu0 %v492_v19  ;;  %504 = vmatpush.bf16.msra.mxu2 %v492_v19 }
  0x1a   :  { %221 = vmatpush.bf16.msra.mxu0 %v491_v20  ;;  %505 = vmatpush.bf16.msra.mxu2 %v491_v20 }
  0x1e   :  { %222 = vmatpush.bf16.msra.mxu0 %v490_v26  ;;  %506 = vmatpush.bf16.msra.mxu2 %v490_v26 }
  0x1f   :  { %467 = vmatmul.msk.bf16.gmra.mxu1 %vm183_vm2, %v381_v25  ;;  %472 = vmatmul.msk.bf16.gmra.mxu3 %vm183_vm2, %v421_v31 }
  0x21   :  { %223 = vmatmul.bf16.vlgmr.msra.gmra.mxu0 %v369_v32  ;;  %243 = vmatmul.bf16.vlgmr.msra.gmra.mxu2 %v401_v33 }
  0x2f   :  { %468 = vmatmul.msk.bf16.gmra.mxu1 %vm183_vm2, %v389_v38  ;;  %473 = vmatmul.msk.bf16.gmra.mxu3 %vm183_vm2, %v429_v43 }
  0x31   :  { %228 = vmatmul.bf16.gmra.mxu0 %v377_v44  ;;  %248 = vmatmul.bf16.gmra.mxu2 %v409_v45 }
  0x3f   :  { %469 = vmatmul.msk.bf16.gmra.mxu1 %vm183_vm2, %v397_v48 }
  0x41   :  { %233 = vmatmul.bf16.gmra.mxu0 %v385_v53  ;;  %253 = vmatmul.bf16.gmra.mxu2 %v417_v54 }
  0x4f   :  { %470 = vmatmul.msk.bf16.gmra.mxu1 %vm183_vm2, %v405_v57 }
  0x51   :  { %238 = vmatmul.bf16.gmra.mxu0 %v393_v62  ;;  %258 = vmatmul.bf16.gmra.mxu2 %v425_v63 }
  0x8c   :  { %v273_v0 = vpop.f32.mrf.mxu1 }
  0x92   :  { %v298_v18 = vpop.f32.mrf.mxu3 }
  0x94   :  { %v275_v1 = vpop.f32.mrf.mxu1 }
  0x9a   :  { %v300_v29 = vpop.f32.mrf.mxu3 }
  0x9c   :  { %v278_v2 = vpop.f32.mrf.mxu1 }
  0x9e   :  { %v224_v4 = vpop.f32.mrf.mxu0 }
  0x9f   :  { %v225_v5 = vadd.f32 %v669_v3, %v224_v4 }
  0xa1   :  { %v274_v6 = vadd.f32 %v273_v0, %v225_v5 }
  0xa2   :  { %v303_v43 = vpop.f32.mrf.mxu3 }
  0xa3   :  { %v313_v7 = vmax.f32 %v274_v6, 0.0 }
  0xa4   :  { %v280_v8 = vpop.f32.mrf.mxu1  ;;  %v244_v10 = vpop.f32.mrf.mxu2 }
  0xa5   :  { %v329_v9 = vpack.c.bf16 %v313_v7, %v313_v7  ;;  %v245_v55 = vadd.f32 %v669_v3, %v244_v10 }
  0xa6   :  { %v226_v11 = vpop.f32.mrf.mxu0 }
  0xa7   :  { %346 = vst.msk [vmem:[%s754_s3] sm:$0xf] %vm345_vm3, %v329_v9  ;;  %v227_v12 = vadd.f32 %v669_v3, %v226_v11 }
  0xa9   :  { %v276_v13 = vadd.f32 %v275_v1, %v227_v12 }
  0xaa   :  { %v305_v58 = vpop.f32.mrf.mxu3 }
  0xab   :  { %v314_v14 = vmax.f32 %v276_v13, 0.0 }
  0xac   :  { %v283_v15 = vpop.f32.mrf.mxu1  ;;  %v246_v17 = vpop.f32.mrf.mxu2 }
  0xad   :  { %v330_v16 = vpack.c.bf16 %v314_v14, %v314_v14 }
  0xae   :  { %v229_v19 = vpop.f32.mrf.mxu0 }
  0xaf   :  { %347 = vst.msk [vmem:[%s754_s3 + $0x4] sm:$0xf] %vm345_vm3, %v330_v16  ;;  %v230_v20 = vadd.f32 %v669_v3, %v229_v19 }
  0xb1   :  { %v279_v21 = vadd.f32 %v278_v2, %v230_v20 }
  0xb3   :  { %v315_v22 = vmax.f32 %v279_v21, 0.0 }
  0xb4   :  { %v285_v23 = vpop.f32.mrf.mxu1  ;;  %v249_v25 = vpop.f32.mrf.mxu2 }
  0xb5   :  { %v331_v24 = vpack.c.bf16 %v315_v22, %v315_v22  ;;  %v250_v26 = vadd.f32 %v669_v3, %v249_v25 }
  0xb6   :  { %v231_v27 = vpop.f32.mrf.mxu0 }
  0xb7   :  { %348 = vst.msk [vmem:[%s754_s3 + $0x8] sm:$0xf] %vm345_vm3, %v331_v24  ;;  %v232_v28 = vadd.f32 %v669_v3, %v231_v27  ;;  %v299_v30 = vadd.f32 %v298_v18, %v250_v26 }
  0xb9   :  { %v281_v31 = vadd.f32 %v280_v8, %v232_v28  ;;  %v323_v32 = vmax.f32 %v299_v30, 0.0  ;;  %v247_v8 = vadd.f32 %v669_v3, %v246_v17 }
  0xbb   :  { %v316_v33 = vmax.f32 %v281_v31, 0.0  ;;  %v339_v35 = vpack.c.bf16 %v323_v32, %v323_v32 }
  0xbc   :  { %v288_v34 = vpop.f32.mrf.mxu1  ;;  %v251_v37 = vpop.f32.mrf.mxu2 }
  0xbd   :  { %v332_v36 = vpack.c.bf16 %v316_v33, %v316_v33  ;;  %356 = vst.msk [vmem:[%s754_s3 + $0x28] sm:$0xf] %vm345_vm3, %v339_v35  ;;  %v252_v38 = vadd.f32 %v669_v3, %v251_v37 }
  0xbe   :  { %v234_v39 = vpop.f32.mrf.mxu0 }
  0xbf   :  { %349 = vst.msk [vmem:[%s754_s3 + $0xc] sm:$0xf] %vm345_vm3, %v332_v36  ;;  %v235_v40 = vadd.f32 %v669_v3, %v234_v39  ;;  %v301_v41 = vadd.f32 %v300_v29, %v252_v38 }
  0xc1   :  { %v284_v42 = vadd.f32 %v283_v15, %v235_v40  ;;  %v324_v44 = vmax.f32 %v301_v41, 0.0  ;;  %v308_v15 = vpop.f32.mrf.mxu3 }
  0xc3   :  { %v317_v45 = vmax.f32 %v284_v42, 0.0  ;;  %v340_v47 = vpack.c.bf16 %v324_v44, %v324_v44 }
  0xc4   :  { %v290_v46 = vpop.f32.mrf.mxu1  ;;  %v254_v49 = vpop.f32.mrf.mxu2 }
  0xc5   :  { %v333_v48 = vpack.c.bf16 %v317_v45, %v317_v45  ;;  %357 = vst.msk [vmem:[%s754_s3 + $0x2c] sm:$0xf] %vm345_vm3, %v340_v47  ;;  %v255_v50 = vadd.f32 %v669_v3, %v254_v49 }
  0xc6   :  { %v236_v51 = vpop.f32.mrf.mxu0 }
  0xc7   :  { %350 = vst.msk [vmem:[%s754_s3 + $0x10] sm:$0xf] %vm345_vm3, %v333_v48  ;;  %v237_v52 = vadd.f32 %v669_v3, %v236_v51  ;;  %v304_v53 = vadd.f32 %v303_v43, %v255_v50 }
  0xc9   :  { %v286_v54 = vadd.f32 %v285_v23, %v237_v52  ;;  %v325_v56 = vmax.f32 %v304_v53, 0.0  ;;  %v310_v30 = vpop.f32.mrf.mxu3 }
  0xcb   :  { %v318_v57 = vmax.f32 %v286_v54, 0.0  ;;  %v341_v60 = vpack.c.bf16 %v325_v56, %v325_v56 }
  0xcc   :  { %v293_v59 = vpop.f32.mrf.mxu1  ;;  %v256_v63 = vpop.f32.mrf.mxu2 }
  0xcd   :  { %v294_v61 = vadd.f32 %v293_v59, %v245_v55  ;;  %v334_v62 = vpack.c.bf16 %v318_v57, %v318_v57  ;;  %358 = vst.msk [vmem:[%s754_s3 + $0x30] sm:$0xf] %vm345_vm3, %v341_v60  ;;  %v257_v1 = vadd.f32 %v669_v3, %v256_v63 }
  0xce   :  { %v239_v2 = vpop.f32.mrf.mxu0 }
  0xcf   :  { %v321_v0 = vmax.f32 %v294_v61, 0.0  ;;  %351 = vst.msk [vmem:[%s754_s3 + $0x14] sm:$0xf] %vm345_vm3, %v334_v62  ;;  %v240_v4 = vadd.f32 %v669_v3, %v239_v2  ;;  %v306_v6 = vadd.f32 %v305_v58, %v257_v1 }
  0xd1   :  { %v337_v5 = vpack.c.bf16 %v321_v0, %v321_v0  ;;  %v289_v7 = vadd.f32 %v288_v34, %v240_v4  ;;  %v326_v9 = vmax.f32 %v306_v6, 0.0 }
  0xd3   :  { %354 = vst.msk [vmem:[%s754_s3 + $0x20] sm:$0xf] %vm345_vm3, %v337_v5  ;;  %v319_v10 = vmax.f32 %v289_v7, 0.0  ;;  %v342_v12 = vpack.c.bf16 %v326_v9, %v326_v9 }
  0xd4   :  { %v295_v11 = vpop.f32.mrf.mxu1  ;;  %v259_v16 = vpop.f32.mrf.mxu2 }
  0xd5   :  { %v296_v13 = vadd.f32 %v295_v11, %v247_v8  ;;  %v335_v14 = vpack.c.bf16 %v319_v10, %v319_v10  ;;  %359 = vst.msk [vmem:[%s754_s3 + $0x34] sm:$0xf] %vm345_vm3, %v342_v12  ;;  %v260_v17 = vadd.f32 %v669_v3, %v259_v16 }
  0xd6   :  { %v241_v19 = vpop.f32.mrf.mxu0 }
  0xd7   :  { %v322_v18 = vmax.f32 %v296_v13, 0.0  ;;  %352 = vst.msk [vmem:[%s754_s3 + $0x18] sm:$0xf] %vm345_vm3, %v335_v14  ;;  %v242_v20 = vadd.f32 %v669_v3, %v241_v19  ;;  %v309_v22 = vadd.f32 %v308_v15, %v260_v17 }
  0xd9   :  { %v338_v21 = vpack.c.bf16 %v322_v18, %v322_v18  ;;  %v291_v23 = vadd.f32 %v290_v46, %v242_v20  ;;  %v327_v24 = vmax.f32 %v309_v22, 0.0 }
  0xdb   :  { %355 = vst.msk [vmem:[%s754_s3 + $0x24] sm:$0xf] %vm345_vm3, %v338_v21  ;;  %v320_v25 = vmax.f32 %v291_v23, 0.0  ;;  %v343_v26 = vpack.c.bf16 %v327_v24, %v327_v24 }
  0xdc   :  { %v261_v28 = vpop.f32.mrf.mxu2 }
  0xdd   :  { %v336_v27 = vpack.c.bf16 %v320_v25, %v320_v25  ;;  %360 = vst.msk [vmem:[%s754_s3 + $0x38] sm:$0xf] %vm345_vm3, %v343_v26  ;;  %v262_v29 = vadd.f32 %v669_v3, %v261_v28 }
  0xdf   :  { %353 = vst.msk [vmem:[%s754_s3 + $0x1c] sm:$0xf] %vm345_vm3, %v336_v27  ;;  %v311_v31 = vadd.f32 %v310_v30, %v262_v29 }
  0xe1   :  { %v328_v32 = vmax.f32 %v311_v31, 0.0 }
  0xe3   :  { %v344_v33 = vpack.c.bf16 %v328_v32, %v328_v32 }
  0xe5   :  { %361 = vst.msk [vmem:[%s754_s3 + $0x3c] sm:$0xf] %vm345_vm3, %v344_v33 }

</bundles_post_ra>
